<compile_context>
chip_gen: v7x
topology: tpu7x:2x2x1
jax: 0.10.0
libtpu: 0.0.40
codegen_flags: <defaults>
</compile_context>

<pallas_src>
import sys
from typing import Any, List, Tuple

import numpy as np
import jax
import jax.numpy as jnp
from jax.experimental import pallas as pl
from jax.experimental.pallas import tpu as pltpu

noise_exempt_keys = [
    'trans_method', 'compression_ratio', 'original_size', 'padded_shape',
    'block_size', 'sampling_ratio', 'n_channels', 'blocks_h', 'blocks_w'
]

_LANE = 128


# ----------------------------------------------------------------------------
# Pallas kernel: identity pass over one tensor leaf (AWGN tensor path).
# The reference AWGN tensor branch returns the input unchanged, so the hot
# path is a tiled, double-buffered VMEM copy.  This is scaffolding for a
# future real-noise / QAM model applied per tile.
# ----------------------------------------------------------------------------
def _channel_copy_kernel(x_ref, o_ref):
    o_ref[...] = x_ref[...]


def _round_up(x: int, m: int) -> int:
    return ((x + m - 1) // m) * m


def _sublane_multiple(dtype) -> int:
    # 8 for 32-bit, 16 for bf16/f16, 32 for int8/fp8 — keeps blocks on packed
    # sublane boundaries for every dtype.
    itemsize = jnp.dtype(dtype).itemsize
    return max(8, 32 // max(itemsize, 1))


def _tile_params() -> Tuple[int, int]:
    """(tile_bytes, vmem_limit_bytes) per chip generation.

    Bigger tiles amortize the ~0.35 us/step pipeline overhead; the limit keeps
    4 live double-buffered tiles (in + out) within the generation's VMEM."""
    try:
        vmem_cap = int(pltpu.get_tpu_info().vmem_capacity_bytes)
    except Exception:
        vmem_cap = 64 * 1024 * 1024  # conservative: v7x has the smallest VMEM
    if vmem_cap >= 128 * 1024 * 1024:            # v5e / v6e: 128 MiB physical
        return 16 * 1024 * 1024, 80 * 1024 * 1024
    return 8 * 1024 * 1024, 40 * 1024 * 1024     # v7x: 64 MiB physical


def channel_identity_pass(x: jax.Array) -> jax.Array:
    """Run the channel pass (identity in the reference) over one array leaf
    with a single lane-dense, pipelined pallas_call."""
    n = int(x.size)
    if n == 0:
        return x

    dtype = x.dtype
    itemsize = jnp.dtype(dtype).itemsize
    sub = _sublane_multiple(dtype)

    # Lane-dense slab: 8 vregs wide (1024 lanes) for real payloads, 128 for
    # tiny ones -> full-width, unmasked vst.
    width = 8 * _LANE if n >= 8 * _LANE else _LANE
    rows = pl.cdiv(n, width)

    # Pad ONLY to the dtype's sublane packing (not to a full tile multiple);
    # the ragged last grid block is handled by Pallas.
    padded_rows = _round_up(rows, sub)
    padded_n = padded_rows * width
    flat = x.reshape(-1)
    if padded_n != n:
        flat = jnp.pad(flat, (0, padded_n - n))
    x2d = flat.reshape(padded_rows, width)

    tile_bytes, vmem_limit = _tile_params()
    budget_rows = max(sub, tile_bytes // (width * itemsize))
    budget_rows -= budget_rows % sub
    tile_rows = min(padded_rows, budget_rows)
    grid = pl.cdiv(padded_rows, tile_rows)

    out2d = pl.pallas_call(
        _channel_copy_kernel,
        out_shape=jax.ShapeDtypeStruct((padded_rows, width), dtype),
        grid=(grid,),
        in_specs=[pl.BlockSpec((tile_rows, width), lambda i: (i, 0))],
        out_specs=pl.BlockSpec((tile_rows, width), lambda i: (i, 0)),
        compiler_params=pltpu.CompilerParams(
            dimension_semantics=("arbitrary",),
            vmem_limit_bytes=vmem_limit,
        ),
        cost_estimate=pl.CostEstimate(
            flops=0, transcendentals=0,
            bytes_accessed=2 * padded_n * itemsize),
    )(x2d)

    if padded_n != n:
        return out2d.reshape(-1)[:n].reshape(x.shape)
    return out2d.reshape(x.shape)


# ----------------------------------------------------------------------------
# Channel module (JAX version of the PyTorch nn.Module).
# ----------------------------------------------------------------------------
class Channel:

    def __init__(self, channel_type: str = 'awgn', snr: float = None,
                 use_pallas_passthrough: bool = False,
                 min_kernel_bytes: int = 256 * 1024):
        self.chan_type = channel_type
        self.snr = snr
        # Default: short-circuit the identity tensor path (zero HBM traffic).
        # Set use_pallas_passthrough=True to route large leaves through the
        # Pallas kernel (scaffold for a future real-noise path).
        self._use_kernel = use_pallas_passthrough
        self._min_kernel_bytes = min_kernel_bytes
        assert self.chan_type in ['none', 'awgn'], 'Only AWGN channel is supported.'

    # ----------------- gaussian_noise_layer (leaf handling) -----------------
    def gaussian_noise_layer(self, input):
        if isinstance(input, jax.Array):
            # Reference torch.Tensor branch: `return input` (identity).
            if (self._use_kernel and
                    input.size * jnp.dtype(input.dtype).itemsize >= self._min_kernel_bytes):
                return channel_identity_pass(input)
            return input
        if isinstance(input, np.ndarray):
            # TODO(synk): qam16ModulationTensor (numpy branch) is an external
            # helper not defined in the spec; pass through unchanged.
            return input
        if isinstance(input, bool) or isinstance(input, int):
            return input
        if isinstance(input, float):
            # TODO(synk): scalar qam16ModulationTensor is external; pass through.
            return input
        if isinstance(input, (str, bytes)):
            # TODO(synk): qam16ModulationString/Bytes are bit-level Python
            # helpers with no Pallas equivalent; pass through.
            return input
        raise ValueError('Unsupported input type.')

    # --------------------------------- qam ----------------------------------
    def qam(self, obj):
        if obj is None:
            return None
        if self.snr is None or self.snr >= 100:
            return obj
        if isinstance(obj, dict):
            return {k: (self.qam(v) if k not in noise_exempt_keys else v)
                    for k, v in obj.items()}
        if isinstance(obj, list):
            return [self.qam(v) for v in obj]
        if isinstance(obj, tuple):
            return tuple(self.qam(v) for v in obj)
        if self.chan_type == 'none':
            return obj
        if self.chan_type == 'awgn':
            return self.gaussian_noise_layer(obj)
        raise ValueError(f'Unsupported channel type {self.chan_type}')

    # -------------------------- size accounting -----------------------------
    def calculate_size_KB(self, data, sparse=False):
        def get_byte_size(obj, sparse=False):
            if obj is None:
                return 0
            if isinstance(obj, int):          # bool is a subclass of int
                return sys.getsizeof(obj)
            if isinstance(obj, float):
                return sys.getsizeof(obj)
            if isinstance(obj, str):
                return len(obj.encode('utf-8'))
            if isinstance(obj, bytes):
                return sys.getsizeof(obj)
            if isinstance(obj, tuple):
                return sum(get_byte_size(v) for v in obj)
            if isinstance(obj, list):
                return sum(get_byte_size(v) for v in obj)
            if isinstance(obj, np.ndarray):
                return obj.nbytes
            if isinstance(obj, jax.Array):
                return obj.dtype.itemsize * obj.size
            if isinstance(obj, dict):
                sizes = {k: get_byte_size(v, sparse) for k, v in obj.items()}
                if 'image' in sizes.keys():
                    # Reference quirk (kept verbatim): the raw-tensor size of
                    # 'image' is replaced by the TOP-LEVEL data['image_byte'].
                    sizes['image'] = data['image_byte']
                return sum(sizes.values())
            raise ValueError(f'Unsupported input type: {type(obj)}')

        size = get_byte_size(data, sparse)
        return size / 1024

    # ------------------------------- forward --------------------------------
    def forward(self, input) -> Tuple[Any, float]:
        return (self.qam(input), self.calculate_size_KB(input))

    __call__ = forward


# ----------------------------------------------------------------------------
# Demo / smoke test
# ----------------------------------------------------------------------------
if __name__ == "__main__":
    key = jax.random.PRNGKey(0)
    k1, k2, k3 = jax.random.split(key, 3)

    # Small NCHW tensor payload plus typical metadata fields (some exempt).
    x = jax.random.normal(k1, (2, 4, 16, 16), dtype=jnp.float32)   # layout: NCHW
    feat = jax.random.normal(k2, (2, 32), dtype=jnp.float32)
    aux = jax.random.normal(k3, (8,), dtype=jnp.float32)

    image_byte = 4096  # pre-encoded image size in bytes (used by calculate_size_KB)

    payload = {
        'image': x,
        'image_byte': image_byte,   # required by the reference size accounting
        'features': feat,
        'aux': [aux, 7],
        'block_size': 8,            # noise-exempt key: passed through untouched
        'compression_ratio': 0.5,   # noise-exempt key
        'label': 3,
    }

    # 1) Default (production) path: identity short-circuit, zero HBM traffic.
    channel_fast = Channel(channel_type='awgn', snr=20.0)
    noisy_fast, size_kb_fast = channel_fast(payload)
    assert noisy_fast['image'] is x                 # true pass-through
    assert noisy_fast['features'] is feat
    assert noisy_fast['aux'][0] is aux

    # 2) Kernel path: route every array leaf through the Pallas identity pass
    #    (threshold 0 so the small demo tensors exercise the kernel).
    channel = Channel(channel_type='awgn', snr=20.0,
                      use_pallas_passthrough=True, min_kernel_bytes=0)
    noisy, size_kb = channel(payload)

    # Block on the Pallas results.
    jax.block_until_ready(noisy['image'])
    jax.block_until_ready(noisy['features'])
    jax.block_until_ready(noisy['aux'][0])

    # Correctness: AWGN tensor path is identity in the reference module.
    assert noisy['image'].shape == x.shape and noisy['image'].dtype == x.dtype
    assert jnp.allclose(noisy['image'], x)
    assert jnp.allclose(noisy['features'], feat)
    assert jnp.allclose(noisy['aux'][0], aux)
    assert noisy['aux'][1] == 7
    assert noisy['block_size'] == 8
    assert noisy['compression_ratio'] == 0.5
    assert noisy['image_byte'] == image_byte
    assert noisy['label'] == 3

    # Size check: 'image' entry is replaced by data['image_byte']; arrays add
    # nbytes; ints/floats add sys.getsizeof.
    expected_bytes = (
        image_byte
        + sys.getsizeof(image_byte)
        + feat.dtype.itemsize * feat.size
        + aux.dtype.itemsize * aux.size + sys.getsizeof(7)
        + sys.getsizeof(8)
        + sys.getsizeof(0.5)
        + sys.getsizeof(3)
    )
    assert abs(size_kb - expected_bytes / 1024) < 1e-9
    assert abs(size_kb_fast - expected_bytes / 1024) < 1e-9

    print("KERNEL_OK")
</pallas_src>

<mosaic_0001>
module attributes {stable_mosaic.version = 11 : i64} {
  func.func @_channel_copy_kernel(%arg0: i32, %arg1: memref<8x1024xf32, #tpu.memory_space<vmem>>, %arg2: memref<8x1024xf32, #tpu.memory_space<vmem>>) attributes {dimension_semantics = [#tpu.dimension_semantics<arbitrary>], iteration_bounds = array<i64: 1>, scalar_prefetch = 0 : i64, scratch_operands = 0 : i64, tpu.core_type = #tpu.core_type<tc>, window_params = [{transform_indices = @transform_0, window_bounds = array<i64: 8, 1024>}, {transform_indices = @transform_1, window_bounds = array<i64: 8, 1024>}]} {
    %c0 = arith.constant 0 : index
    %c0_0 = arith.constant 0 : index
    %0 = vector.load %arg1[%c0, %c0_0] : memref<8x1024xf32, #tpu.memory_space<vmem>>, vector<8x1024xf32>
    %c0_1 = arith.constant 0 : index
    %c0_2 = arith.constant 0 : index
    %1 = vector.load %arg2[%c0_1, %c0_2] : memref<8x1024xf32, #tpu.memory_space<vmem>>, vector<8x1024xf32>
    tpu.vector_store %arg2[%c0_1, %c0_2], %0 {strides = array<i32>} : memref<8x1024xf32, #tpu.memory_space<vmem>>, vector<8x1024xf32>,
    return
  }
  func.func @transform_0(%arg0: i32) -> (i32, i32) {
    %c0_i32 = arith.constant 0 : i32
    %c0_i32_0 = arith.constant 0 : i32
    return %arg0, %c0_i32 : i32, i32
  }
  func.func @transform_1(%arg0: i32) -> (i32, i32) {
    %c0_i32 = arith.constant 0 : i32
    %c0_i32_0 = arith.constant 0 : i32
    return %arg0, %c0_i32 : i32, i32
  }
}

</mosaic_0001>

<bundles_post_ra>
// kernel: tpu_custom_call.1
= control target key start
LH: loop header
LB: loop body
LE: loop exit
PB: predicated region body
PF: predicated region fallthrough
CT: control target
= control target key end

     0   :  { %6 = vsyncpa [#allocation3], 0  ;;  %s138_s0 = inlined_call_operand.hbm [shape: f32[8,1024], index: 0, kind: input, shape index: {}]   ;;  %s139_s1 = inlined_call_operand.hbm [shape: f32[8,1024], index: 1, kind: output, shape index: {}]  }
   0x1   :  { %7 = vsyncpa [#allocation4], 0  ;;  %s102_s6 = smov [#allocation2]   ;;  %s54_s10 = scalar_lea.hbm %s138_s0, 1024 }
   0x2   :  { %s14_s7 = sshll.u32 %s102_s6, 4  ;;  %p55_p0 = scmp.ne.s32.totalorder %s138_s0, %s54_s10  ;;  %s15_s7 = int_to_ptr.vmem [resolvable:$true] %s14_s7 }
   0x3   :  { %p58_p1 = scmp.lt.u32.totalorder %s54_s10, %s138_s0 }
   0x5   :  { %p60_p2 = pnand %p58_p1, %p55_p0 }
   0x7   :  { %63 = shalt.err (!%p60_p2)
}
   0x8   :  { %s64_s15 = scalar_lea.vmem %s15_s7, 1024  ;;  %p69_p4 = scmp.lt.s32.totalorder %s15_s7, %s15_s7 }
   0x9   :  { %p65_p3 = scmp.ne.s32.totalorder %s15_s7, %s64_s15  ;;  %p70_p5 = scmp.lt.s32.totalorder %s64_s15, %s64_s15 }
   0xb   :  { %p71_p6 = por %p70_p5, %p69_p4 }
   0xd   :  { %p72_p7 = pnand %p71_p6, %p65_p3 }
   0xf   :  { %75 = shalt.err (!%p72_p7)
}
  0x10   :  { %17 = dma.hbm_to_vmem [thread:$0]  %s138_s0, 1024, %s15_s7, [#allocation3]  }
  0x11   :  { %98 = dma.done.wait [#allocation3], 1024  }
  0x12   :  { %99 = vsyncadd [#allocation3], 4294966272  ;;  %s103_s18 = smov [#allocation5]   ;;  %v21_v0 = vld [vmem:[#allocation2] sm:$0xff]  ;;  %v22_v1 = vld [vmem:[#allocation2 + $0x8] sm:$0xff] }
  0x13   :  { %s43_s19 = sshll.u32 %s103_s18, 4  ;;  %v23_v2 = vld [vmem:[#allocation2 + $0x10] sm:$0xff]  ;;  %29 = vst [vmem:[#allocation5] sm:$0xff] %v21_v0  ;;  %30 = vst [vmem:[#allocation5 + $0x8] sm:$0xff] %v22_v1  ;;  %v24_v3 = vld [vmem:[#allocation2 + $0x18] sm:$0xff]  ;;  %s44_s19 = int_to_ptr.vmem [resolvable:$true] %s43_s19 }
  0x14   :  { %31 = vst [vmem:[#allocation5 + $0x10] sm:$0xff] %v23_v2  ;;  %v25_v4 = vld [vmem:[#allocation2 + $0x20] sm:$0xff]  ;;  %v26_v5 = vld [vmem:[#allocation2 + $0x28] sm:$0xff]  ;;  %32 = vst [vmem:[#allocation5 + $0x18] sm:$0xff] %v24_v3  ;;  %s76_s0 = scalar_lea.vmem %s44_s19, 1024  ;;  %p81_p9 = scmp.lt.s32.totalorder %s44_s19, %s44_s19 }
  0x15   :  { %33 = vst [vmem:[#allocation5 + $0x20] sm:$0xff] %v25_v4  ;;  %34 = vst [vmem:[#allocation5 + $0x28] sm:$0xff] %v26_v5  ;;  %v27_v6 = vld [vmem:[#allocation2 + $0x30] sm:$0xff]  ;;  %v28_v7 = vld [vmem:[#allocation2 + $0x38] sm:$0xff]  ;;  %p77_p8 = scmp.ne.s32.totalorder %s44_s19, %s76_s0  ;;  %p82_p10 = scmp.lt.s32.totalorder %s76_s0, %s76_s0 }
  0x16   :  { %35 = vst [vmem:[#allocation5 + $0x30] sm:$0xff] %v27_v6  ;;  %36 = vst [vmem:[#allocation5 + $0x38] sm:$0xff] %v28_v7 }
  0x17   :  { %p83_p11 = por %p82_p10, %p81_p9 }
  0x19   :  { %p84_p12 = pnand %p83_p11, %p77_p8 }
  0x1b   :  { %87 = shalt.err (!%p84_p12)
}
  0x1c   :  { %s88_s22 = scalar_lea.hbm %s139_s1, 1024 }
  0x1d   :  { %p89_p13 = scmp.ne.s32.totalorder %s139_s1, %s88_s22  ;;  %p92_p0 = scmp.lt.u32.totalorder %s88_s22, %s139_s1 }
  0x1f   :  { %p94_p1 = pnand %p92_p0, %p89_p13 }
  0x21   :  { %97 = shalt.err (!%p94_p1)
}
  0x22   :  { %46 = dma.vmem_to_hbm [thread:$0]  %s44_s19, 1024, %s139_s1, [#allocation4]  }
  0x23   :  { %100 = dma.done.wait [#allocation4], 1024  }
  0x24   :  { %101 = vsyncadd [#allocation4], 4294966272 }
  0x25   :  { %50 = vsyncpa [#allocation3], 1 }
  0x26   :  { %51 = vsyncpa [#allocation4], 1 }

</bundles_post_ra>
